<compile_context>
chip_gen: v6e
topology: v6e:2x2x1
jax: 0.10.0
libtpu: 0.0.40
codegen_flags: <defaults>
</compile_context>

<pallas_src>
import jax
import jax.numpy as jnp
from jax.experimental import pallas as pl
from jax.experimental.pallas import tpu as pltpu

_LANES = 128


def _round_up(x, m):
    return ((x + m - 1) // m) * m


def _choose_tiles(B, F):
    """Byte-budgeted tile selection (generation-safe).

    Returns (TB, TK, B_pad, F_pad):
      * F is padded to a multiple of 128; TK is the largest multiple of 128 that
        divides F_pad, capped at 2048 lanes (so the x tile stays small).
      * TB keeps the x block <= 4 MiB (double-buffered 8 MiB -> well inside the
        16 MiB v5e scoped default and v7x's 64 MiB physical VMEM), is a multiple
        of 128 for large B (unmasked lane-dense output stores, megacore split),
        and caps at ceil(B/2) rounded up so >= 2 tiles exist whenever B > 128.
    """
    F_pad = _round_up(F, _LANES)
    n_chunks = F_pad // _LANES

    tk_chunks = 1
    for d in range(min(n_chunks, 16), 0, -1):  # TK <= 2048 lanes
        if n_chunks % d == 0:
            tk_chunks = d
            break
    TK = tk_chunks * _LANES

    x_budget_bytes = 4 * 1024 * 1024           # per buffer; Pallas double-buffers
    max_rows = max(8, x_budget_bytes // (TK * 4))

    if B <= 128:
        TB = max(8, _round_up(B, 8))            # tiny batch: one small tile
    else:
        TB = min(1024, (max_rows // 128) * 128)
        TB = max(TB, 128)
        # at least two batch tiles so the "parallel" axis feeds both v7x cores
        TB = min(TB, _round_up((B + 1) // 2, 128))

    B_pad = _round_up(B, TB)
    return TB, TK, B_pad, F_pad


def _mlp_kernel(x_ref, w_ref, b_ref, o_ref, acc_ref):
    """One (batch_tile, k_tile) grid step.

    x_ref : (TB, TK) VMEM     w_ref : (1, TK) VMEM     b_ref : (1,) SMEM
    o_ref : (1, TB) VMEM (lane-dense output)
    acc_ref: (TB, 128) f32 VMEM scratch (per-row lane-partial sums)
    """
    k = pl.program_id(1)

    @pl.when(k == 0)
    def _init():
        acc_ref[...] = jnp.zeros_like(acc_ref)

    # Fused multiply-accumulate in 128-lane chunks: pure VPU work into the
    # (TB, 128) lane-partial. No cross-lane (XLU) reduce here and no (TB, TK)
    # product materialized in VMEM.
    n_chunks = x_ref.shape[1] // _LANES
    partial = x_ref[:, 0:_LANES] * w_ref[:, 0:_LANES]
    for c in range(1, n_chunks):
        lo = c * _LANES
        partial = partial + x_ref[:, lo:lo + _LANES] * w_ref[:, lo:lo + _LANES]
    acc_ref[...] += partial.astype(jnp.float32)

    # Finalize on the last reduction step: one XLU lane reduce + scalar bias,
    # stored lane-dense as (1, TB).
    @pl.when(k == pl.num_programs(1) - 1)
    def _finish():
        s = jnp.sum(acc_ref[...], axis=-1)                       # (TB,)
        o_ref[...] = (s + b_ref[0])[None, :].astype(o_ref.dtype)


def mlp_forward(x, weight, bias):
    """x: (B, F) f32; weight: (1, F) (PyTorch nn.Linear layout); bias: (1,).

    Returns (B, 1), matching nn.Linear(F, 1).
    """
    B, F = x.shape
    TB, TK, B_pad, F_pad = _choose_tiles(B, F)

    pad_b, pad_f = B_pad - B, F_pad - F
    if pad_b or pad_f:
        x = jnp.pad(x, ((0, pad_b), (0, pad_f)))
    if pad_f:
        weight = jnp.pad(weight, ((0, 0), (0, pad_f)))

    grid = (B_pad // TB, F_pad // TK)

    out_lane = pl.pallas_call(
        _mlp_kernel,
        out_shape=jax.ShapeDtypeStruct((1, B_pad), x.dtype),
        grid=grid,
        in_specs=[
            pl.BlockSpec((TB, TK), lambda i, k: (i, k)),         # x batch/k tile
            pl.BlockSpec((1, TK), lambda i, k: (0, k)),          # weight k tile
            pl.BlockSpec(memory_space=pltpu.MemorySpace.SMEM),   # bias scalar
        ],
        out_specs=pl.BlockSpec((1, TB), lambda i, k: (0, i)),    # lane-dense out
        scratch_shapes=[pltpu.VMEM((TB, _LANES), jnp.float32)],  # accumulator
        compiler_params=pltpu.CompilerParams(
            dimension_semantics=("parallel", "arbitrary"),
            vmem_limit_bytes=32 * 1024 * 1024,
        ),
        cost_estimate=pl.CostEstimate(
            flops=2 * B * F,
            transcendentals=0,
            bytes_accessed=4 * (B * F + F + B),
        ),
    )(x, weight, bias)

    # (1, B_pad) lane-dense kernel output -> (B, 1) to match nn.Linear semantics.
    return out_lane[0, :B].reshape(B, 1)


if __name__ == "__main__":
    key = jax.random.PRNGKey(0)
    kx, kw, kb = jax.random.split(key, 3)

    # Demo size matching the module's intended use (nn.Linear(max_feature, 1)).
    batch = 8
    max_feature = 32

    x = jax.random.normal(kx, (batch, max_feature), dtype=jnp.float32)
    bound = 1.0 / jnp.sqrt(jnp.float32(max_feature))
    weight = jax.random.uniform(kw, (1, max_feature), dtype=jnp.float32,
                                minval=-bound, maxval=bound)
    bias = jax.random.uniform(kb, (1,), dtype=jnp.float32,
                              minval=-bound, maxval=bound)

    out = mlp_forward(x, weight, bias)
    jax.block_until_ready(out)

    ref = x @ weight.T + bias
    assert out.shape == (batch, 1)
    assert jnp.allclose(out, ref, atol=1e-5, rtol=1e-5)

    # Second check: unaligned B/F exercising zero-padding, multiple batch tiles
    # and a multi-step reduction (k) grid axis.
    B2, F2 = 130, 2100
    x2 = jax.random.normal(kx, (B2, F2), dtype=jnp.float32)
    w2 = jax.random.uniform(kw, (1, F2), dtype=jnp.float32, minval=-0.05, maxval=0.05)
    b2 = jax.random.uniform(kb, (1,), dtype=jnp.float32, minval=-0.05, maxval=0.05)
    out2 = mlp_forward(x2, w2, b2)
    jax.block_until_ready(out2)
    ref2 = x2 @ w2.T + b2
    assert out2.shape == (B2, 1)
    assert jnp.allclose(out2, ref2, atol=1e-4, rtol=1e-4)

    print("KERNEL_OK")
</pallas_src>

<mosaic_0001>
module attributes {stable_mosaic.version = 11 : i64} {
  func.func @_mlp_kernel(%arg0: i32, %arg1: i32, %arg2: memref<8x128xf32, #tpu.memory_space<vmem>>, %arg3: memref<1x128xf32, #tpu.memory_space<vmem>>, %arg4: memref<1xf32, #tpu.memory_space<smem>>, %arg5: memref<1x8xf32, #tpu.memory_space<vmem>>, %arg6: memref<8x128xf32, #tpu.memory_space<vmem>>) attributes {dimension_semantics = [#tpu.dimension_semantics<parallel>, #tpu.dimension_semantics<arbitrary>], iteration_bounds = array<i64: 1, 1>, scalar_prefetch = 0 : i64, scratch_operands = 1 : i64, tpu.core_type = #tpu.core_type<tc>, window_params = [{transform_indices = @transform_0, window_bounds = array<i64: 8, 128>}, {transform_indices = @transform_1, window_bounds = array<i64: 1, 128>}, {transform_indices = @transform_2, window_bounds = array<i64: 1>}, {transform_indices = @transform_3, window_bounds = array<i64: 1, 8>}]} {
    %c0_i32 = arith.constant 0 : i32
    %0 = arith.cmpi eq, %arg1, %c0_i32 : i32
    %1 = arith.extui %0 : i1 to i32
    %c0_i32_0 = arith.constant 0 : i32
    %2 = arith.cmpi ne, %1, %c0_i32_0 : i32
    scf.if %2 {
      %cst = arith.constant 0.000000e+00 : f32
      %13 = vector.broadcast %cst : f32 to vector<8x128xf32>
      %c0_10 = arith.constant 0 : index
      %c0_11 = arith.constant 0 : index
      %14 = vector.load %arg6[%c0_10, %c0_11] : memref<8x128xf32, #tpu.memory_space<vmem>>, vector<8x128xf32>
      tpu.vector_store %arg6[%c0_10, %c0_11], %13 {strides = array<i32>} : memref<8x128xf32, #tpu.memory_space<vmem>>, vector<8x128xf32>,
    } else {
    }
    %c0 = arith.constant 0 : index
    %c0_1 = arith.constant 0 : index
    %3 = vector.load %arg2[%c0, %c0_1] : memref<8x128xf32, #tpu.memory_space<vmem>>, vector<8x128xf32>
    %c0_2 = arith.constant 0 : index
    %c0_3 = arith.constant 0 : index
    %4 = vector.load %arg3[%c0_2, %c0_3] : memref<1x128xf32, #tpu.memory_space<vmem>>, vector<1x128xf32>
    %5 = vector.broadcast %4 : vector<1x128xf32> to vector<8x128xf32>
    %6 = arith.mulf %3, %5 : vector<8x128xf32>
    %c0_4 = arith.constant 0 : index
    %c0_5 = arith.constant 0 : index
    %7 = vector.load %arg6[%c0_4, %c0_5] : memref<8x128xf32, #tpu.memory_space<vmem>>, vector<8x128xf32>
    %8 = arith.addf %7, %6 : vector<8x128xf32>
    %c0_6 = arith.constant 0 : index
    %c0_7 = arith.constant 0 : index
    %9 = vector.load %arg6[%c0_6, %c0_7] : memref<8x128xf32, #tpu.memory_space<vmem>>, vector<8x128xf32>
    tpu.vector_store %arg6[%c0_6, %c0_7], %8 {strides = array<i32>} : memref<8x128xf32, #tpu.memory_space<vmem>>, vector<8x128xf32>,
    %c0_i32_8 = arith.constant 0 : i32
    %10 = arith.cmpi eq, %arg1, %c0_i32_8 : i32
    %11 = arith.extui %10 : i1 to i32
    %c0_i32_9 = arith.constant 0 : i32
    %12 = arith.cmpi ne, %11, %c0_i32_9 : i32
    scf.if %12 {
      %c0_10 = arith.constant 0 : index
      %c0_11 = arith.constant 0 : index
      %13 = vector.load %arg6[%c0_10, %c0_11] : memref<8x128xf32, #tpu.memory_space<vmem>>, vector<8x128xf32>
      %cst = arith.constant dense<0.000000e+00> : vector<8xf32>
      %14 = vector.multi_reduction <add>, %13, %cst [1] : vector<8x128xf32> to vector<8xf32>
      %c0_12 = arith.constant 0 : index
      %15 = memref.load %arg4[%c0_12] : memref<1xf32, #tpu.memory_space<smem>>
      %16 = vector.broadcast %15 : f32 to vector<8xf32>
      %17 = arith.addf %14, %16 : vector<8xf32>
      %18 = vector.shape_cast %17 : vector<8xf32> to vector<1x8xf32>
      %c0_13 = arith.constant 0 : index
      %c0_14 = arith.constant 0 : index
      %19 = vector.load %arg5[%c0_13, %c0_14] : memref<1x8xf32, #tpu.memory_space<vmem>>, vector<1x8xf32>
      tpu.vector_store %arg5[%c0_13, %c0_14], %18 {strides = array<i32>} : memref<1x8xf32, #tpu.memory_space<vmem>>, vector<1x8xf32>,
    } else {
    }
    return
  }
  func.func @transform_0(%arg0: i32, %arg1: i32) -> (i32, i32) {
    %c0_i32 = arith.constant 0 : i32
    return %arg0, %arg1 : i32, i32
  }
  func.func @transform_1(%arg0: i32, %arg1: i32) -> (i32, i32) {
    %c0_i32 = arith.constant 0 : i32
    %c0_i32_0 = arith.constant 0 : i32
    return %c0_i32, %arg1 : i32, i32
  }
  func.func @transform_2(%arg0: i32, %arg1: i32) -> i32 {
    %c0_i32 = arith.constant 0 : i32
    %c0_i32_0 = arith.constant 0 : i32
    return %c0_i32 : i32
  }
  func.func @transform_3(%arg0: i32, %arg1: i32) -> (i32, i32) {
    %c0_i32 = arith.constant 0 : i32
    %c0_i32_0 = arith.constant 0 : i32
    return %c0_i32, %arg0 : i32, i32
  }
}

</mosaic_0001>

<bundles_post_ra>
// kernel: tpu_custom_call.1
= control target key start
LH: loop header
LB: loop body
LE: loop exit
PB: predicated region body
PF: predicated region fallthrough
CT: control target
= control target key end

     0   :  { %9 = vsyncpa [#allocation5], 0  ;;  %s160_s0 = inlined_call_operand.hbm [shape: f32[8,128], index: 0, kind: input, shape index: {}]   ;;  %s161_s1 = inlined_call_operand.vmem [shape: f32[1,128], index: 1, kind: input, shape index: {}]   ;;  %s162_s2 = inlined_call_operand.<no memory space> [shape: f32[1], index: 2, kind: input, shape index: {}]   ;;  %s163_s3 = inlined_call_operand.hbm [shape: f32[1,8], index: 3, kind: output, shape index: {}]  }
   0x1   :  { %10 = vsyncpa [#allocation6], 0  ;;  %s126_s12 = smov [#allocation4]  }
   0x2   :  { %s17_s13 = sshll.u32 %s126_s12, 4  ;;  %s18_s13 = int_to_ptr.vmem [resolvable:$true] %s17_s13 }
   0x3   :  { %s90_s14 = scalar_lea.vmem %s18_s13, 128  ;;  %p95_p1 = scmp.lt.s32.totalorder %s18_s13, %s18_s13 }
   0x4   :  { %p91_p0 = scmp.ne.s32.totalorder %s18_s13, %s90_s14  ;;  %p96_p2 = scmp.lt.s32.totalorder %s90_s14, %s90_s14 }
   0x6   :  { %p97_p3 = por %p96_p2, %p95_p1 }
   0x8   :  { %p98_p4 = pnand %p97_p3, %p91_p0 }
   0xa   :  { %101 = shalt.err (!%p98_p4)
}
   0xb   :  { %20 = dma.hbm_to_vmem [thread:$0]  %s160_s0, 128, %s18_s13, [#allocation5]  }
   0xc   :  { %122 = dma.done.wait [#allocation5], 128  }
   0xd   :  { %123 = vsyncadd [#allocation5], 4294967168  ;;  %v33_v0 = vld [vmem:[#allocation4] sm:$0xff]  ;;  %v55_v3 = vlaneseq  ;;  %v52_v6 = vstv %s162_s2  ;;  %s127_s21 = smov [#allocation7]   ;;  %vm62_vm0 = vcmask 57344  }
   0xe   :  { %v79_v1 = vld [vmem:[%s161_s1] ss:$0 sm:$0xff]  ;;  %s70_s0 = sshll.u32 %s127_s21, 4  ;;  %s71_s0 = int_to_ptr.vmem [resolvable:$true] %s70_s0 }
   0xf   :  { %v41_v2 = vmul.f32 %v79_v1, %v33_v0  ;;  %v56_v4 = vand.u32 127, %v55_v3  ;;  %v58_v5 = vshrl.u32 %v55_v3, 7  ;;  %s102_s22 = scalar_lea.vmem %s71_s0, 16  ;;  %s106_s1 = scalar_lea.vmem %s71_s0, 32 }
  0x10   :  { %p103_p5 = scmp.ne.s32.totalorder %s71_s0, %s102_s22  ;;  %p107_p6 = scmp.lt.s32.totalorder %s71_s0, %s71_s0 }
  0x11   :  { %49 = vadd.xlane.f32.xlu0 %v41_v2  ;;  %v59_v7 = vsub.s32 %v56_v4, %v58_v5  ;;  %p108_p7 = scmp.lt.s32.totalorder %s106_s1, %s102_s22 }
  0x13   :  { %p109_p8 = por %p108_p7, %p107_p6 }
  0x15   :  { %p110_p9 = pnand %p109_p8, %p103_p5 }
  0x9a   :  { %v50_v8 = vpop.xlane.xlu0 %49 }
  0x9b   :  { %v53_v9 = vadd.f32 %v52_v6, %v50_v8 }
  0x9d   :  { %v60_v10 = vrot.slane %v53_v9, %v59_v7 }
  0x9f   :  { %63 = vst.msk [vmem:[#allocation7] sm:$0x1] %vm62_vm0, %v60_v10 }
  0xa0   :  { %113 = shalt.err (!%p110_p9)
}
  0xa1   :  { %73 = dma.vmem_to_hbm [thread:$0]  %s71_s0, 16, %s163_s3, [#allocation6]  }
  0xa2   :  { %124 = dma.done.wait [#allocation6], 16  }
  0xa3   :  { %125 = vsyncadd [#allocation6], 4294967280 }
  0xa4   :  { %77 = vsyncpa [#allocation5], 1 }
  0xa5   :  { %78 = vsyncpa [#allocation6], 1 }

</bundles_post_ra>
